<compile_context>
chip_gen: v7x
topology: tpu7x:2x2x1
jax: 0.10.0
libtpu: 0.0.40
codegen_flags: <defaults>
</compile_context>

<pallas_src>
import functools

import jax
import jax.numpy as jnp
from jax.experimental import pallas as pl
from jax.experimental.pallas import tpu as pltpu


def _round_up(v, m):
    return (v + m - 1) // m * m


def _softplus(x):
    # Branch-free, numerically stable; matches torch.nn.functional.softplus
    # (beta=1, threshold=20) to within fp32 tolerance.
    return jnp.maximum(x, 0.0) + jnp.log1p(jnp.exp(-jnp.abs(x)))


def _sigmoid(x):
    return 1.0 / (1.0 + jnp.exp(-x))


def _slab(p_ref, slot):
    off, r, c = slot  # static python ints -> static slice of the packed slab
    return p_ref[off:off + r, 0:c]


def _base_mlp(p_ref, layout, prefix, n_layers, h_dim, z):
    """Residual-softplus MLP: (rows, in_dim) -> (rows, out_dim)."""
    g = lambda name: _slab(p_ref, layout[prefix + name])

    # layer0 (fused shortcut): one MXU push computes both the 'a' path and the
    # linear shortcut; b0bs = b0b + b0s was folded offline.
    za = jnp.dot(z, g("w0as"), preferred_element_type=jnp.float32)      # (rows, 2h)
    h1 = _softplus(za[:, :h_dim] + g("b0a"))
    h = _softplus(jnp.dot(h1, g("w0b"), preferred_element_type=jnp.float32)
                  + za[:, h_dim:2 * h_dim] + g("b0bs"))

    # layer1: n_layers x LinearRes(h->h), identity shortcut. Static unroll is
    # fine for small n_layers; switch to lax.fori_loop(unroll=True) if it grows.
    for l in range(n_layers):
        t = _softplus(jnp.dot(h, g(f"w1a{l}"),
                              preferred_element_type=jnp.float32) + g(f"b1a{l}"))
        t = jnp.dot(t, g(f"w1b{l}"),
                    preferred_element_type=jnp.float32) + g(f"b1b{l}")
        h = _softplus(t + h)

    # layer2: plain Linear(h -> out)
    return jnp.dot(h, g("w2"), preferred_element_type=jnp.float32) + g("b2")


def _net2b_kernel(x_dim, c_dim, h_dim, y_dim, n_layers, x_scale, layout,
                  xc_ref, p_ref, out_ref):
    xc = xc_ref[...]                              # (rows, x_dim + c_dim)
    c = xc[:, x_dim:x_dim + c_dim]                # c is a lane-slice of xc (no extra DMA)

    # TODO(synk): alpha/gamma usage inside BaseNet is unknown; only x_scale is applied.
    y1 = _base_mlp(p_ref, layout, "A_", n_layers[0], h_dim,
                   xc * x_scale)                  # (rows, y_dim*h_dim)
    y2 = _sigmoid(_base_mlp(p_ref, layout, "B_", n_layers[1], h_dim,
                            c * x_scale))         # (rows, h_dim)

    # bmm(y1.view(N,y_dim,h_dim), y2.view(N,h_dim,1)): per-row dot along h.
    # Lane-slices of y1 (no relayout) + one XLU lane-reduce per column; the
    # whole (rows, y_dim) tile is stored with a single write.
    cols = []
    for j in range(y_dim):
        seg = y1[:, j * h_dim:(j + 1) * h_dim]
        cols.append(jnp.sum(seg * y2, axis=-1, keepdims=True))
    out_ref[...] = jnp.concatenate(cols, axis=-1)


def net2b_forward(x, c, packed_params, layout, *, x_dim, c_dim, h_dim, y_dim,
                  n_layers, x_scale=1.0):
    """Full Net2b forward (predict2 + sigmoid on netB) in one pallas_call."""
    assert x.shape[1] == x_dim and c.shape[1] == c_dim
    N = x.shape[0]
    block_rows = min(_round_up(max(N, 1), 8), 128)
    n_pad = _round_up(max(N, 1), block_rows)

    xc = jnp.concatenate([x, c], axis=1).astype(jnp.float32)
    xc = jnp.pad(xc, ((0, n_pad - N), (0, 0)))

    kernel = functools.partial(_net2b_kernel, x_dim, c_dim, h_dim, y_dim,
                               tuple(n_layers), float(x_scale), layout)

    out = pl.pallas_call(
        kernel,
        out_shape=jax.ShapeDtypeStruct((n_pad, y_dim), jnp.float32),
        grid_spec=pltpu.PrefetchScalarGridSpec(
            num_scalar_prefetch=0,
            grid=(n_pad // block_rows,),
            in_specs=[
                # row-block of the batched activations
                pl.BlockSpec((block_rows, x_dim + c_dim), lambda i: (i, 0)),
                # single packed parameter slab (one DMA), resident across blocks
                pl.BlockSpec(packed_params.shape, lambda i: (0, 0)),
            ],
            out_specs=pl.BlockSpec((block_rows, y_dim), lambda i: (i, 0)),
        ),
        compiler_params=pltpu.CompilerParams(
            dimension_semantics=("parallel",)),   # shard row blocks across TCs (v7x)
    )(xc, packed_params)
    return out[:N]


class _ParamPacker:
    """Packs 2-D parameter arrays row-wise into one lane-dense f32 slab.

    Row offsets are rounded up to multiples of 8 (sublane tile) so every
    in-kernel slice is a clean static sub-tile view.
    """

    def __init__(self):
        self._arrays = []
        self._rows = 0
        self.layout = {}

    def add(self, name, arr):
        arr = jnp.asarray(arr, jnp.float32)
        assert arr.ndim == 2
        off = self._rows
        self.layout[name] = (off, int(arr.shape[0]), int(arr.shape[1]))
        self._arrays.append((off, arr))
        self._rows = _round_up(off + arr.shape[0], 8)

    def finalize(self):
        width = _round_up(max(a.shape[1] for _, a in self._arrays), 128)
        rows = _round_up(self._rows, 8)
        buf = jnp.zeros((rows, width), jnp.float32)
        for off, a in self._arrays:
            buf = buf.at[off:off + a.shape[0], :a.shape[1]].set(a)
        return buf


def pack_net2b_params(params_a, params_b, n_layers):
    """Fuses the layer-0 shortcut and packs both nets into a single slab."""
    pk = _ParamPacker()
    for prefix, p, nl in (("A_", params_a, n_layers[0]),
                          ("B_", params_b, n_layers[1])):
        pk.add(prefix + "w0as", jnp.concatenate([p["w0a"], p["w0s"]], axis=1))
        pk.add(prefix + "b0a", p["b0a"])
        pk.add(prefix + "w0b", p["w0b"])
        pk.add(prefix + "b0bs", p["b0b"] + p["b0s"])
        for l in range(nl):
            pk.add(f"{prefix}w1a{l}", p["w1a"][l])
            pk.add(f"{prefix}b1a{l}", p["b1a"][l])
            pk.add(f"{prefix}w1b{l}", p["w1b"][l])
            pk.add(f"{prefix}b1b{l}", p["b1b"][l])
        pk.add(prefix + "w2", p["w2"])
        pk.add(prefix + "b2", p["b2"])
    return pk.finalize(), pk.layout


def init_base_net(key, in_dim, h_dim, n_layers, out_dim):
    """PyTorch nn.Linear-style init (uniform +-1/sqrt(fan_in))."""
    ks = jax.random.split(key, 12)

    def lin(k, fan_in, shape):
        bound = 1.0 / jnp.sqrt(jnp.float32(fan_in))
        return jax.random.uniform(k, shape, jnp.float32, -bound, bound)

    return {
        "w0a": lin(ks[0], in_dim, (in_dim, h_dim)),
        "b0a": lin(ks[1], in_dim, (1, h_dim)),
        "w0b": lin(ks[2], h_dim, (h_dim, h_dim)),
        "b0b": lin(ks[3], h_dim, (1, h_dim)),
        "w0s": lin(ks[4], in_dim, (in_dim, h_dim)),
        "b0s": lin(ks[5], in_dim, (1, h_dim)),
        "w1a": lin(ks[6], h_dim, (n_layers, h_dim, h_dim)),
        "b1a": lin(ks[7], h_dim, (n_layers, 1, h_dim)),
        "w1b": lin(ks[8], h_dim, (n_layers, h_dim, h_dim)),
        "b1b": lin(ks[9], h_dim, (n_layers, 1, h_dim)),
        "w2": lin(ks[10], h_dim, (h_dim, out_dim)),
        "b2": lin(ks[11], h_dim, (1, out_dim)),
    }


def _base_mlp_reference(p, n_layers, z):
    h = _softplus(z @ p["w0a"] + p["b0a"])
    h = h @ p["w0b"] + p["b0b"]
    s = z @ p["w0s"] + p["b0s"]
    h = _softplus(h + s)
    for l in range(n_layers):
        t = _softplus(h @ p["w1a"][l] + p["b1a"][l])
        t = t @ p["w1b"][l] + p["b1b"][l]
        h = _softplus(t + h)
    return h @ p["w2"] + p["b2"]


def net2b_reference(x, c, params_a, params_b, h_dim, y_dim, n_layers, x_scale=1.0):
    """Pure-JAX reference of Net2b.forward (un-fused), for the correctness check."""
    N = x.shape[0]
    xc = jnp.concatenate([x, c], axis=1)
    y1 = _base_mlp_reference(params_a, n_layers[0], xc * x_scale)
    y2 = _sigmoid(_base_mlp_reference(params_b, n_layers[1], c * x_scale))
    y1 = y1.reshape(N, y_dim, h_dim)
    y2 = y2.reshape(N, h_dim, 1)
    return jnp.matmul(y1, y2).reshape(N, y_dim)


if __name__ == "__main__":
    # Small shapes consistent with Net2b's forward.
    x_dim, c_dim, h_dim, y_dim = 16, 8, 32, 4
    n_layers = 2
    if isinstance(n_layers, (int, float)):
        n_layers = (int(n_layers), int(n_layers))
    x_scale = 1.0   # alpha/gamma unused (see TODO above)
    N = 2

    key = jax.random.PRNGKey(0)
    k_x, k_c, k_a, k_b = jax.random.split(key, 4)
    x = jax.random.normal(k_x, (N, x_dim), jnp.float32)
    c = jax.random.normal(k_c, (N, c_dim), jnp.float32)

    # netA: (x_dim + c_dim) -> y_dim * h_dim ; netB: c_dim -> h_dim (+ sigmoid)
    params_a = init_base_net(k_a, x_dim + c_dim, h_dim, n_layers[0], y_dim * h_dim)
    params_b = init_base_net(k_b, c_dim, h_dim, n_layers[1], h_dim)
    packed, layout = pack_net2b_params(params_a, params_b, n_layers)

    y = net2b_forward(x, c, packed, layout, x_dim=x_dim, c_dim=c_dim,
                      h_dim=h_dim, y_dim=y_dim, n_layers=n_layers,
                      x_scale=x_scale)
    jax.block_until_ready(y)

    y_ref = net2b_reference(x, c, params_a, params_b, h_dim, y_dim, n_layers,
                            x_scale)
    assert y.shape == (N, y_dim)
    assert jnp.allclose(y, y_ref, atol=2e-4, rtol=2e-4), \
        float(jnp.max(jnp.abs(y - y_ref)))

    print("KERNEL_OK")
</pallas_src>

<mosaic_0001>
module attributes {stable_mosaic.version = 11 : i64} {
  func.func @_net2b_kernel(%arg0: i32, %arg1: memref<8x24xf32, #tpu.memory_space<vmem>>, %arg2: memref<528x128xf32, #tpu.memory_space<vmem>>, %arg3: memref<8x4xf32, #tpu.memory_space<vmem>>) attributes {dimension_semantics = [#tpu.dimension_semantics<parallel>], iteration_bounds = array<i64: 1>, scalar_prefetch = 0 : i64, scratch_operands = 0 : i64, tpu.core_type = #tpu.core_type<tc>, window_params = [{transform_indices = @transform_0, window_bounds = array<i64: 8, 24>}, {pipeline_mode = #tpu.pipeline_mode<synchronous>, transform_indices = @transform_1, window_bounds = array<i64: 528, 128>}, {transform_indices = @transform_2, window_bounds = array<i64: 8, 4>}]} {
    %c0 = arith.constant 0 : index
    %c0_0 = arith.constant 0 : index
    %0 = vector.load %arg1[%c0, %c0_0] : memref<8x24xf32, #tpu.memory_space<vmem>>, vector<8x24xf32>
    %1 = vector.extract_strided_slice %0 {offsets = [0, 16], sizes = [8, 8], strides = [1, 1]} : vector<8x24xf32> to vector<8x8xf32>
    %cst = arith.constant 1.000000e+00 : f32
    %2 = vector.broadcast %cst : f32 to vector<8x24xf32>
    %3 = arith.mulf %0, %2 : vector<8x24xf32>
    %c0_1 = arith.constant 0 : index
    %c0_2 = arith.constant 0 : index
    %4 = vector.load %arg2[%c0_1, %c0_2] : memref<528x128xf32, #tpu.memory_space<vmem>>, vector<24x64xf32>
    %cst_3 = arith.constant dense<0.000000e+00> : vector<8x64xf32>
    %5 = tpu.matmul %3, %4, %cst_3 {dimension_numbers = #tpu.dot_dimension_numbers<[1], [0], [0], [1], [0, 0, 1, 1], [], []>} : vector<8x24xf32>, vector<24x64xf32>, vector<8x64xf32> -> vector<8x64xf32>
    %6 = vector.extract_strided_slice %5 {offsets = [0, 0], sizes = [8, 32], strides = [1, 1]} : vector<8x64xf32> to vector<8x32xf32>
    %c24 = arith.constant 24 : index
    %c0_4 = arith.constant 0 : index
    %7 = vector.load %arg2[%c24, %c0_4] : memref<528x128xf32, #tpu.memory_space<vmem>>, vector<1x32xf32>
    %8 = vector.broadcast %7 : vector<1x32xf32> to vector<8x32xf32>
    %9 = arith.addf %6, %8 : vector<8x32xf32>
    %cst_5 = arith.constant 0.000000e+00 : f32
    %10 = vector.broadcast %cst_5 : f32 to vector<8x32xf32>
    %11 = arith.maximumf %9, %10 : vector<8x32xf32>
    %12 = math.absf %9 : vector<8x32xf32>
    %cst_6 = arith.constant 0.000000e+00 : f32
    %13 = vector.broadcast %cst_6 : f32 to vector<8x32xf32>
    %14 = arith.subf %13, %12 : vector<8x32xf32>
    %15 = math.exp %14 : vector<8x32xf32>
    %16 = math.log1p %15 : vector<8x32xf32>
    %17 = arith.addf %11, %16 : vector<8x32xf32>
    %c32 = arith.constant 32 : index
    %c0_7 = arith.constant 0 : index
    %18 = vector.load %arg2[%c32, %c0_7] : memref<528x128xf32, #tpu.memory_space<vmem>>, vector<32x32xf32>
    %cst_8 = arith.constant dense<0.000000e+00> : vector<8x32xf32>
    %19 = tpu.matmul %17, %18, %cst_8 {dimension_numbers = #tpu.dot_dimension_numbers<[1], [0], [0], [1], [0, 0, 1, 1], [], []>} : vector<8x32xf32>, vector<32x32xf32>, vector<8x32xf32> -> vector<8x32xf32>
    %20 = vector.extract_strided_slice %5 {offsets = [0, 32], sizes = [8, 32], strides = [1, 1]} : vector<8x64xf32> to vector<8x32xf32>
    %21 = arith.addf %19, %20 : vector<8x32xf32>
    %c64 = arith.constant 64 : index
    %c0_9 = arith.constant 0 : index
    %22 = vector.load %arg2[%c64, %c0_9] : memref<528x128xf32, #tpu.memory_space<vmem>>, vector<1x32xf32>
    %23 = vector.broadcast %22 : vector<1x32xf32> to vector<8x32xf32>
    %24 = arith.addf %21, %23 : vector<8x32xf32>
    %cst_10 = arith.constant 0.000000e+00 : f32
    %25 = vector.broadcast %cst_10 : f32 to vector<8x32xf32>
    %26 = arith.maximumf %24, %25 : vector<8x32xf32>
    %27 = math.absf %24 : vector<8x32xf32>
    %cst_11 = arith.constant 0.000000e+00 : f32
    %28 = vector.broadcast %cst_11 : f32 to vector<8x32xf32>
    %29 = arith.subf %28, %27 : vector<8x32xf32>
    %30 = math.exp %29 : vector<8x32xf32>
    %31 = math.log1p %30 : vector<8x32xf32>
    %32 = arith.addf %26, %31 : vector<8x32xf32>
    %c72 = arith.constant 72 : index
    %c0_12 = arith.constant 0 : index
    %33 = vector.load %arg2[%c72, %c0_12] : memref<528x128xf32, #tpu.memory_space<vmem>>, vector<32x32xf32>
    %cst_13 = arith.constant dense<0.000000e+00> : vector<8x32xf32>
    %34 = tpu.matmul %32, %33, %cst_13 {dimension_numbers = #tpu.dot_dimension_numbers<[1], [0], [0], [1], [0, 0, 1, 1], [], []>} : vector<8x32xf32>, vector<32x32xf32>, vector<8x32xf32> -> vector<8x32xf32>
    %c104 = arith.constant 104 : index
    %c0_14 = arith.constant 0 : index
    %35 = vector.load %arg2[%c104, %c0_14] : memref<528x128xf32, #tpu.memory_space<vmem>>, vector<1x32xf32>
    %36 = vector.broadcast %35 : vector<1x32xf32> to vector<8x32xf32>
    %37 = arith.addf %34, %36 : vector<8x32xf32>
    %cst_15 = arith.constant 0.000000e+00 : f32
    %38 = vector.broadcast %cst_15 : f32 to vector<8x32xf32>
    %39 = arith.maximumf %37, %38 : vector<8x32xf32>
    %40 = math.absf %37 : vector<8x32xf32>
    %cst_16 = arith.constant 0.000000e+00 : f32
    %41 = vector.broadcast %cst_16 : f32 to vector<8x32xf32>
    %42 = arith.subf %41, %40 : vector<8x32xf32>
    %43 = math.exp %42 : vector<8x32xf32>
    %44 = math.log1p %43 : vector<8x32xf32>
    %45 = arith.addf %39, %44 : vector<8x32xf32>
    %c112 = arith.constant 112 : index
    %c0_17 = arith.constant 0 : index
    %46 = vector.load %arg2[%c112, %c0_17] : memref<528x128xf32, #tpu.memory_space<vmem>>, vector<32x32xf32>
    %cst_18 = arith.constant dense<0.000000e+00> : vector<8x32xf32>
    %47 = tpu.matmul %45, %46, %cst_18 {dimension_numbers = #tpu.dot_dimension_numbers<[1], [0], [0], [1], [0, 0, 1, 1], [], []>} : vector<8x32xf32>, vector<32x32xf32>, vector<8x32xf32> -> vector<8x32xf32>
    %c144 = arith.constant 144 : index
    %c0_19 = arith.constant 0 : index
    %48 = vector.load %arg2[%c144, %c0_19] : memref<528x128xf32, #tpu.memory_space<vmem>>, vector<1x32xf32>
    %49 = vector.broadcast %48 : vector<1x32xf32> to vector<8x32xf32>
    %50 = arith.addf %47, %49 : vector<8x32xf32>
    %51 = arith.addf %50, %32 : vector<8x32xf32>
    %cst_20 = arith.constant 0.000000e+00 : f32
    %52 = vector.broadcast %cst_20 : f32 to vector<8x32xf32>
    %53 = arith.maximumf %51, %52 : vector<8x32xf32>
    %54 = math.absf %51 : vector<8x32xf32>
    %cst_21 = arith.constant 0.000000e+00 : f32
    %55 = vector.broadcast %cst_21 : f32 to vector<8x32xf32>
    %56 = arith.subf %55, %54 : vector<8x32xf32>
    %57 = math.exp %56 : vector<8x32xf32>
    %58 = math.log1p %57 : vector<8x32xf32>
    %59 = arith.addf %53, %58 : vector<8x32xf32>
    %c152 = arith.constant 152 : index
    %c0_22 = arith.constant 0 : index
    %60 = vector.load %arg2[%c152, %c0_22] : memref<528x128xf32, #tpu.memory_space<vmem>>, vector<32x32xf32>
    %cst_23 = arith.constant dense<0.000000e+00> : vector<8x32xf32>
    %61 = tpu.matmul %59, %60, %cst_23 {dimension_numbers = #tpu.dot_dimension_numbers<[1], [0], [0], [1], [0, 0, 1, 1], [], []>} : vector<8x32xf32>, vector<32x32xf32>, vector<8x32xf32> -> vector<8x32xf32>
    %c184 = arith.constant 184 : index
    %c0_24 = arith.constant 0 : index
    %62 = vector.load %arg2[%c184, %c0_24] : memref<528x128xf32, #tpu.memory_space<vmem>>, vector<1x32xf32>
    %63 = vector.broadcast %62 : vector<1x32xf32> to vector<8x32xf32>
    %64 = arith.addf %61, %63 : vector<8x32xf32>
    %cst_25 = arith.constant 0.000000e+00 : f32
    %65 = vector.broadcast %cst_25 : f32 to vector<8x32xf32>
    %66 = arith.maximumf %64, %65 : vector<8x32xf32>
    %67 = math.absf %64 : vector<8x32xf32>
    %cst_26 = arith.constant 0.000000e+00 : f32
    %68 = vector.broadcast %cst_26 : f32 to vector<8x32xf32>
    %69 = arith.subf %68, %67 : vector<8x32xf32>
    %70 = math.exp %69 : vector<8x32xf32>
    %71 = math.log1p %70 : vector<8x32xf32>
    %72 = arith.addf %66, %71 : vector<8x32xf32>
    %c192 = arith.constant 192 : index
    %c0_27 = arith.constant 0 : index
    %73 = vector.load %arg2[%c192, %c0_27] : memref<528x128xf32, #tpu.memory_space<vmem>>, vector<32x32xf32>
    %cst_28 = arith.constant dense<0.000000e+00> : vector<8x32xf32>
    %74 = tpu.matmul %72, %73, %cst_28 {dimension_numbers = #tpu.dot_dimension_numbers<[1], [0], [0], [1], [0, 0, 1, 1], [], []>} : vector<8x32xf32>, vector<32x32xf32>, vector<8x32xf32> -> vector<8x32xf32>
    %c224 = arith.constant 224 : index
    %c0_29 = arith.constant 0 : index
    %75 = vector.load %arg2[%c224, %c0_29] : memref<528x128xf32, #tpu.memory_space<vmem>>, vector<1x32xf32>
    %76 = vector.broadcast %75 : vector<1x32xf32> to vector<8x32xf32>
    %77 = arith.addf %74, %76 : vector<8x32xf32>
    %78 = arith.addf %77, %59 : vector<8x32xf32>
    %cst_30 = arith.constant 0.000000e+00 : f32
    %79 = vector.broadcast %cst_30 : f32 to vector<8x32xf32>
    %80 = arith.maximumf %78, %79 : vector<8x32xf32>
    %81 = math.absf %78 : vector<8x32xf32>
    %cst_31 = arith.constant 0.000000e+00 : f32
    %82 = vector.broadcast %cst_31 : f32 to vector<8x32xf32>
    %83 = arith.subf %82, %81 : vector<8x32xf32>
    %84 = math.exp %83 : vector<8x32xf32>
    %85 = math.log1p %84 : vector<8x32xf32>
    %86 = arith.addf %80, %85 : vector<8x32xf32>
    %c232 = arith.constant 232 : index
    %c0_32 = arith.constant 0 : index
    %87 = vector.load %arg2[%c232, %c0_32] : memref<528x128xf32, #tpu.memory_space<vmem>>, vector<32x128xf32>
    %cst_33 = arith.constant dense<0.000000e+00> : vector<8x128xf32>
    %88 = tpu.matmul %86, %87, %cst_33 {dimension_numbers = #tpu.dot_dimension_numbers<[1], [0], [0], [1], [0, 0, 1, 1], [], []>} : vector<8x32xf32>, vector<32x128xf32>, vector<8x128xf32> -> vector<8x128xf32>
    %c264 = arith.constant 264 : index
    %c0_34 = arith.constant 0 : index
    %89 = vector.load %arg2[%c264, %c0_34] : memref<528x128xf32, #tpu.memory_space<vmem>>, vector<1x128xf32>
    %90 = vector.broadcast %89 : vector<1x128xf32> to vector<8x128xf32>
    %91 = arith.addf %88, %90 : vector<8x128xf32>
    %cst_35 = arith.constant 1.000000e+00 : f32
    %92 = vector.broadcast %cst_35 : f32 to vector<8x8xf32>
    %93 = arith.mulf %1, %92 : vector<8x8xf32>
    %c272 = arith.constant 272 : index
    %c0_36 = arith.constant 0 : index
    %94 = vector.load %arg2[%c272, %c0_36] : memref<528x128xf32, #tpu.memory_space<vmem>>, vector<8x64xf32>
    %cst_37 = arith.constant dense<0.000000e+00> : vector<8x64xf32>
    %95 = tpu.matmul %93, %94, %cst_37 {dimension_numbers = #tpu.dot_dimension_numbers<[1], [0], [0], [1], [0, 0, 1, 1], [], []>} : vector<8x8xf32>, vector<8x64xf32>, vector<8x64xf32> -> vector<8x64xf32>
    %96 = vector.extract_strided_slice %95 {offsets = [0, 0], sizes = [8, 32], strides = [1, 1]} : vector<8x64xf32> to vector<8x32xf32>
    %c280 = arith.constant 280 : index
    %c0_38 = arith.constant 0 : index
    %97 = vector.load %arg2[%c280, %c0_38] : memref<528x128xf32, #tpu.memory_space<vmem>>, vector<1x32xf32>
    %98 = vector.broadcast %97 : vector<1x32xf32> to vector<8x32xf32>
    %99 = arith.addf %96, %98 : vector<8x32xf32>
    %cst_39 = arith.constant 0.000000e+00 : f32
    %100 = vector.broadcast %cst_39 : f32 to vector<8x32xf32>
    %101 = arith.maximumf %99, %100 : vector<8x32xf32>
    %102 = math.absf %99 : vector<8x32xf32>
    %cst_40 = arith.constant 0.000000e+00 : f32
    %103 = vector.broadcast %cst_40 : f32 to vector<8x32xf32>
    %104 = arith.subf %103, %102 : vector<8x32xf32>
    %105 = math.exp %104 : vector<8x32xf32>
    %106 = math.log1p %105 : vector<8x32xf32>
    %107 = arith.addf %101, %106 : vector<8x32xf32>
    %c288 = arith.constant 288 : index
    %c0_41 = arith.constant 0 : index
    %108 = vector.load %arg2[%c288, %c0_41] : memref<528x128xf32, #tpu.memory_space<vmem>>, vector<32x32xf32>
    %cst_42 = arith.constant dense<0.000000e+00> : vector<8x32xf32>
    %109 = tpu.matmul %107, %108, %cst_42 {dimension_numbers = #tpu.dot_dimension_numbers<[1], [0], [0], [1], [0, 0, 1, 1], [], []>} : vector<8x32xf32>, vector<32x32xf32>, vector<8x32xf32> -> vector<8x32xf32>
    %110 = vector.extract_strided_slice %95 {offsets = [0, 32], sizes = [8, 32], strides = [1, 1]} : vector<8x64xf32> to vector<8x32xf32>
    %111 = arith.addf %109, %110 : vector<8x32xf32>
    %c320 = arith.constant 320 : index
    %c0_43 = arith.constant 0 : index
    %112 = vector.load %arg2[%c320, %c0_43] : memref<528x128xf32, #tpu.memory_space<vmem>>, vector<1x32xf32>
    %113 = vector.broadcast %112 : vector<1x32xf32> to vector<8x32xf32>
    %114 = arith.addf %111, %113 : vector<8x32xf32>
    %cst_44 = arith.constant 0.000000e+00 : f32
    %115 = vector.broadcast %cst_44 : f32 to vector<8x32xf32>
    %116 = arith.maximumf %114, %115 : vector<8x32xf32>
    %117 = math.absf %114 : vector<8x32xf32>
    %cst_45 = arith.constant 0.000000e+00 : f32
    %118 = vector.broadcast %cst_45 : f32 to vector<8x32xf32>
    %119 = arith.subf %118, %117 : vector<8x32xf32>
    %120 = math.exp %119 : vector<8x32xf32>
    %121 = math.log1p %120 : vector<8x32xf32>
    %122 = arith.addf %116, %121 : vector<8x32xf32>
    %c328 = arith.constant 328 : index
    %c0_46 = arith.constant 0 : index
    %123 = vector.load %arg2[%c328, %c0_46] : memref<528x128xf32, #tpu.memory_space<vmem>>, vector<32x32xf32>
    %cst_47 = arith.constant dense<0.000000e+00> : vector<8x32xf32>
    %124 = tpu.matmul %122, %123, %cst_47 {dimension_numbers = #tpu.dot_dimension_numbers<[1], [0], [0], [1], [0, 0, 1, 1], [], []>} : vector<8x32xf32>, vector<32x32xf32>, vector<8x32xf32> -> vector<8x32xf32>
    %c360 = arith.constant 360 : index
    %c0_48 = arith.constant 0 : index
    %125 = vector.load %arg2[%c360, %c0_48] : memref<528x128xf32, #tpu.memory_space<vmem>>, vector<1x32xf32>
    %126 = vector.broadcast %125 : vector<1x32xf32> to vector<8x32xf32>
    %127 = arith.addf %124, %126 : vector<8x32xf32>
    %cst_49 = arith.constant 0.000000e+00 : f32
    %128 = vector.broadcast %cst_49 : f32 to vector<8x32xf32>
    %129 = arith.maximumf %127, %128 : vector<8x32xf32>
    %130 = math.absf %127 : vector<8x32xf32>
    %cst_50 = arith.constant 0.000000e+00 : f32
    %131 = vector.broadcast %cst_50 : f32 to vector<8x32xf32>
    %132 = arith.subf %131, %130 : vector<8x32xf32>
    %133 = math.exp %132 : vector<8x32xf32>
    %134 = math.log1p %133 : vector<8x32xf32>
    %135 = arith.addf %129, %134 : vector<8x32xf32>
    %c368 = arith.constant 368 : index
    %c0_51 = arith.constant 0 : index
    %136 = vector.load %arg2[%c368, %c0_51] : memref<528x128xf32, #tpu.memory_space<vmem>>, vector<32x32xf32>
    %cst_52 = arith.constant dense<0.000000e+00> : vector<8x32xf32>
    %137 = tpu.matmul %135, %136, %cst_52 {dimension_numbers = #tpu.dot_dimension_numbers<[1], [0], [0], [1], [0, 0, 1, 1], [], []>} : vector<8x32xf32>, vector<32x32xf32>, vector<8x32xf32> -> vector<8x32xf32>
    %c400 = arith.constant 400 : index
    %c0_53 = arith.constant 0 : index
    %138 = vector.load %arg2[%c400, %c0_53] : memref<528x128xf32, #tpu.memory_space<vmem>>, vector<1x32xf32>
    %139 = vector.broadcast %138 : vector<1x32xf32> to vector<8x32xf32>
    %140 = arith.addf %137, %139 : vector<8x32xf32>
    %141 = arith.addf %140, %122 : vector<8x32xf32>
    %cst_54 = arith.constant 0.000000e+00 : f32
    %142 = vector.broadcast %cst_54 : f32 to vector<8x32xf32>
    %143 = arith.maximumf %141, %142 : vector<8x32xf32>
    %144 = math.absf %141 : vector<8x32xf32>
    %cst_55 = arith.constant 0.000000e+00 : f32
    %145 = vector.broadcast %cst_55 : f32 to vector<8x32xf32>
    %146 = arith.subf %145, %144 : vector<8x32xf32>
    %147 = math.exp %146 : vector<8x32xf32>
    %148 = math.log1p %147 : vector<8x32xf32>
    %149 = arith.addf %143, %148 : vector<8x32xf32>
    %c408 = arith.constant 408 : index
    %c0_56 = arith.constant 0 : index
    %150 = vector.load %arg2[%c408, %c0_56] : memref<528x128xf32, #tpu.memory_space<vmem>>, vector<32x32xf32>
    %cst_57 = arith.constant dense<0.000000e+00> : vector<8x32xf32>
    %151 = tpu.matmul %149, %150, %cst_57 {dimension_numbers = #tpu.dot_dimension_numbers<[1], [0], [0], [1], [0, 0, 1, 1], [], []>} : vector<8x32xf32>, vector<32x32xf32>, vector<8x32xf32> -> vector<8x32xf32>
    %c440 = arith.constant 440 : index
    %c0_58 = arith.constant 0 : index
    %152 = vector.load %arg2[%c440, %c0_58] : memref<528x128xf32, #tpu.memory_space<vmem>>, vector<1x32xf32>
    %153 = vector.broadcast %152 : vector<1x32xf32> to vector<8x32xf32>
    %154 = arith.addf %151, %153 : vector<8x32xf32>
    %cst_59 = arith.constant 0.000000e+00 : f32
    %155 = vector.broadcast %cst_59 : f32 to vector<8x32xf32>
    %156 = arith.maximumf %154, %155 : vector<8x32xf32>
    %157 = math.absf %154 : vector<8x32xf32>
    %cst_60 = arith.constant 0.000000e+00 : f32
    %158 = vector.broadcast %cst_60 : f32 to vector<8x32xf32>
    %159 = arith.subf %158, %157 : vector<8x32xf32>
    %160 = math.exp %159 : vector<8x32xf32>
    %161 = math.log1p %160 : vector<8x32xf32>
    %162 = arith.addf %156, %161 : vector<8x32xf32>
    %c448 = arith.constant 448 : index
    %c0_61 = arith.constant 0 : index
    %163 = vector.load %arg2[%c448, %c0_61] : memref<528x128xf32, #tpu.memory_space<vmem>>, vector<32x32xf32>
    %cst_62 = arith.constant dense<0.000000e+00> : vector<8x32xf32>
    %164 = tpu.matmul %162, %163, %cst_62 {dimension_numbers = #tpu.dot_dimension_numbers<[1], [0], [0], [1], [0, 0, 1, 1], [], []>} : vector<8x32xf32>, vector<32x32xf32>, vector<8x32xf32> -> vector<8x32xf32>
    %c480 = arith.constant 480 : index
    %c0_63 = arith.constant 0 : index
    %165 = vector.load %arg2[%c480, %c0_63] : memref<528x128xf32, #tpu.memory_space<vmem>>, vector<1x32xf32>
    %166 = vector.broadcast %165 : vector<1x32xf32> to vector<8x32xf32>
    %167 = arith.addf %164, %166 : vector<8x32xf32>
    %168 = arith.addf %167, %149 : vector<8x32xf32>
    %cst_64 = arith.constant 0.000000e+00 : f32
    %169 = vector.broadcast %cst_64 : f32 to vector<8x32xf32>
    %170 = arith.maximumf %168, %169 : vector<8x32xf32>
    %171 = math.absf %168 : vector<8x32xf32>
    %cst_65 = arith.constant 0.000000e+00 : f32
    %172 = vector.broadcast %cst_65 : f32 to vector<8x32xf32>
    %173 = arith.subf %172, %171 : vector<8x32xf32>
    %174 = math.exp %173 : vector<8x32xf32>
    %175 = math.log1p %174 : vector<8x32xf32>
    %176 = arith.addf %170, %175 : vector<8x32xf32>
    %c488 = arith.constant 488 : index
    %c0_66 = arith.constant 0 : index
    %177 = vector.load %arg2[%c488, %c0_66] : memref<528x128xf32, #tpu.memory_space<vmem>>, vector<32x32xf32>
    %cst_67 = arith.constant dense<0.000000e+00> : vector<8x32xf32>
    %178 = tpu.matmul %176, %177, %cst_67 {dimension_numbers = #tpu.dot_dimension_numbers<[1], [0], [0], [1], [0, 0, 1, 1], [], []>} : vector<8x32xf32>, vector<32x32xf32>, vector<8x32xf32> -> vector<8x32xf32>
    %c520 = arith.constant 520 : index
    %c0_68 = arith.constant 0 : index
    %179 = vector.load %arg2[%c520, %c0_68] : memref<528x128xf32, #tpu.memory_space<vmem>>, vector<1x32xf32>
    %180 = vector.broadcast %179 : vector<1x32xf32> to vector<8x32xf32>
    %181 = arith.addf %178, %180 : vector<8x32xf32>
    %cst_69 = arith.constant 0.000000e+00 : f32
    %182 = vector.broadcast %cst_69 : f32 to vector<8x32xf32>
    %183 = arith.subf %182, %181 : vector<8x32xf32>
    %184 = math.exp %183 : vector<8x32xf32>
    %cst_70 = arith.constant 1.000000e+00 : f32
    %185 = vector.broadcast %cst_70 : f32 to vector<8x32xf32>
    %186 = arith.addf %185, %184 : vector<8x32xf32>
    %cst_71 = arith.constant 1.000000e+00 : f32
    %187 = vector.broadcast %cst_71 : f32 to vector<8x32xf32>
    %188 = arith.divf %187, %186 : vector<8x32xf32>
    %189 = vector.extract_strided_slice %91 {offsets = [0, 0], sizes = [8, 32], strides = [1, 1]} : vector<8x128xf32> to vector<8x32xf32>
    %190 = arith.mulf %189, %188 : vector<8x32xf32>
    %cst_72 = arith.constant dense<0.000000e+00> : vector<8xf32>
    %191 = vector.multi_reduction <add>, %190, %cst_72 [1] : vector<8x32xf32> to vector<8xf32>
    %192 = vector.shape_cast %191 : vector<8xf32> to vector<8x1xf32>
    %193 = vector.extract_strided_slice %91 {offsets = [0, 32], sizes = [8, 32], strides = [1, 1]} : vector<8x128xf32> to vector<8x32xf32>
    %194 = arith.mulf %193, %188 : vector<8x32xf32>
    %cst_73 = arith.constant dense<0.000000e+00> : vector<8xf32>
    %195 = vector.multi_reduction <add>, %194, %cst_73 [1] : vector<8x32xf32> to vector<8xf32>
    %196 = vector.shape_cast %195 : vector<8xf32> to vector<8x1xf32>
    %197 = vector.extract_strided_slice %91 {offsets = [0, 64], sizes = [8, 32], strides = [1, 1]} : vector<8x128xf32> to vector<8x32xf32>
    %198 = arith.mulf %197, %188 : vector<8x32xf32>
    %cst_74 = arith.constant dense<0.000000e+00> : vector<8xf32>
    %199 = vector.multi_reduction <add>, %198, %cst_74 [1] : vector<8x32xf32> to vector<8xf32>
    %200 = vector.shape_cast %199 : vector<8xf32> to vector<8x1xf32>
    %201 = vector.extract_strided_slice %91 {offsets = [0, 96], sizes = [8, 32], strides = [1, 1]} : vector<8x128xf32> to vector<8x32xf32>
    %202 = arith.mulf %201, %188 : vector<8x32xf32>
    %cst_75 = arith.constant dense<0.000000e+00> : vector<8xf32>
    %203 = vector.multi_reduction <add>, %202, %cst_75 [1] : vector<8x32xf32> to vector<8xf32>
    %204 = vector.shape_cast %203 : vector<8xf32> to vector<8x1xf32>
    %205 = tpu.concatenate %192, %196, %200, %204 in 1 : vector<8x1xf32>, vector<8x1xf32>, vector<8x1xf32>, vector<8x1xf32> -> vector<8x4xf32>
    %c0_76 = arith.constant 0 : index
    %c0_77 = arith.constant 0 : index
    %206 = vector.load %arg3[%c0_76, %c0_77] : memref<8x4xf32, #tpu.memory_space<vmem>>, vector<8x4xf32>
    tpu.vector_store %arg3[%c0_76, %c0_77], %205 {strides = array<i32>} : memref<8x4xf32, #tpu.memory_space<vmem>>, vector<8x4xf32>,
    return
  }
  func.func @transform_0(%arg0: i32) -> (i32, i32) {
    %c0_i32 = arith.constant 0 : i32
    %c0_i32_0 = arith.constant 0 : i32
    return %arg0, %c0_i32 : i32, i32
  }
  func.func @transform_1(%arg0: i32) -> (i32, i32) {
    %c0_i32 = arith.constant 0 : i32
    %c0_i32_0 = arith.constant 0 : i32
    %c0_i32_1 = arith.constant 0 : i32
    return %c0_i32, %c0_i32_0 : i32, i32
  }
  func.func @transform_2(%arg0: i32) -> (i32, i32) {
    %c0_i32 = arith.constant 0 : i32
    %c0_i32_0 = arith.constant 0 : i32
    return %arg0, %c0_i32 : i32, i32
  }
}

</mosaic_0001>

<bundles_post_ra>
// kernel: tpu_custom_call.1
= control target key start
LH: loop header
LB: loop body
LE: loop exit
PB: predicated region body
PF: predicated region fallthrough
CT: control target
= control target key end

     0   :  { %7 = vsyncpa [#allocation3], 0  ;;  %s2012_s0 = inlined_call_operand.hbm [shape: f32[8,24], index: 0, kind: input, shape index: {}]   ;;  %s2013_s1 = inlined_call_operand.hbm [shape: f32[528,128], index: 1, kind: input, shape index: {}]   ;;  %s2014_s2 = inlined_call_operand.vmem [shape: f32[8,4], index: 2, kind: output, shape index: {}]  }
   0x1   :  { %8 = vsyncpa [#allocation5], 0  ;;  %s1866_s9 = smov [#allocation2]   ;;  %s1867_s11 = smov [#allocation4]  }
   0x2   :  { %s15_s10 = sshll.u32 %s1866_s9, 4  ;;  %s24_s12 = sshll.u32 %s1867_s11, 4  ;;  %s16_s10 = int_to_ptr.vmem [resolvable:$true] %s15_s10  ;;  %s1892_s12 = int_to_ptr.vmem [resolvable:$true] %s24_s12 }
   0x3   :  { %s1818_s15 = scalar_lea.hbm %s2012_s0, 128 }
   0x4   :  { %p1819_p0 = scmp.ne.s32.totalorder %s2012_s0, %s1818_s15  ;;  %p1822_p1 = scmp.lt.u32.totalorder %s1818_s15, %s2012_s0 }
   0x6   :  { %p1824_p2 = pnand %p1822_p1, %p1819_p0 }
   0x8   :  { %1827 = shalt.err (!%p1824_p2)
}
   0x9   :  { %s1828_s20 = scalar_lea.vmem %s16_s10, 128  ;;  %p1833_p4 = scmp.lt.s32.totalorder %s16_s10, %s16_s10 }
   0xa   :  { %p1829_p3 = scmp.ne.s32.totalorder %s16_s10, %s1828_s20  ;;  %p1834_p5 = scmp.lt.s32.totalorder %s1828_s20, %s1828_s20 }
   0xc   :  { %p1835_p6 = por %p1834_p5, %p1833_p4 }
   0xe   :  { %p1836_p7 = pnand %p1835_p6, %p1829_p3 }
  0x10   :  { %1839 = shalt.err (!%p1836_p7)
}
  0x11   :  { %18 = dma.hbm_to_vmem [thread:$0]  %s2012_s0, 128, %s16_s10, [#allocation3]  }
  0x12   :  { %s1840_s25 = scalar_lea.hbm %s2013_s1, 8448 }
  0x13   :  { %p1841_p8 = scmp.ne.s32.totalorder %s2013_s1, %s1840_s25  ;;  %p1844_p9 = scmp.lt.u32.totalorder %s1840_s25, %s2013_s1 }
  0x15   :  { %p1846_p10 = pnand %p1844_p9, %p1841_p8 }
  0x17   :  { %1849 = shalt.err (!%p1846_p10)
}
  0x18   :  { %s1850_s30 = scalar_lea.vmem %s1892_s12, 8448  ;;  %p1855_p12 = scmp.lt.s32.totalorder %s1892_s12, %s1892_s12 }
  0x19   :  { %p1851_p11 = scmp.ne.s32.totalorder %s1892_s12, %s1850_s30  ;;  %p1856_p13 = scmp.lt.s32.totalorder %s1850_s30, %s1850_s30 }
  0x1b   :  { %p1857_p0 = por %p1856_p13, %p1855_p12 }
  0x1d   :  { %p1858_p1 = pnand %p1857_p0, %p1851_p11 }
  0x1f   :  { %1861 = shalt.err (!%p1858_p1)
}
  0x20   :  { %s1868_s0 = smov 128   ;;  %s1869_s3 = smov 8  }
  0x21   :  { %30 = dma.hbm_to_vmem [thread:$0]  %s2013_s1, 8448, %s1892_s12, [#allocation5], %s1868_s0, %s1868_s0, %s1869_s3  }
  0x22   :  { %1862 = dma.done.wait [#allocation3], 128  }
  0x23   :  { %1863 = vsyncadd [#allocation3], 4294967168 }
  0x24   :  { %1864 = dma.done.wait [#allocation5], 8448  }
  0x25   :  { %1865 = vsyncadd [#allocation5], 4294958848  ;;  %v1870_v0 = vmov 0.0|0.0   ;;  %vm1871_vm0 = vmmov 0   ;;  %v1872_v1 = vmov 0.0   ;;  %v38_v2 = vld [vmem:[#allocation4] sm:$0xff] }
  0x26   :  { %1680 = vmatprep.subr.bf16.mxu0 %v1870_v0  ;;  %1540 = vmatprep.mubr.msk.f32.mxu0 %vm1871_vm0, %v1872_v1  ;;  %v39_v3 = vld [vmem:[#allocation4 + $0x8] sm:$0xff]  ;;  %v40_v5 = vld [vmem:[#allocation4 + $0x10] sm:$0xff]  ;;  %v1930_v6 = vld [vmem:[#allocation2] sm:$0xff]  ;;  %vm41_vm1 = vcmask 195584   ;;  %s1873_s1 = smov 96   ;;  %vm144_vm3 = vcmask 261120  }
  0x27   :  { %1683 = vmatprep.subr.bf16.mxu1 %v1870_v0  ;;  %1551 = vmatprep.mubr.msk.f32.mxu1 %vm1871_vm0, %v1872_v1  ;;  %v1681_v4 = vpack.c.bf16 %v39_v3, %v38_v2  ;;  %v136_v7 = vld [vmem:[#allocation4 + $0x20] sm:$0xff]  ;;  %v137_v8 = vld [vmem:[#allocation4 + $0x28] sm:$0xff]  ;;  %v138_v10 = vld [vmem:[#allocation4 + $0x30] sm:$0xff]  ;;  %s1874_s6 = smov 112   ;;  %vm714_vm8 = vcmask 64512   ;;  %s1875_s7 = smov 64  }
  0x28   :  { %v1684_v9 = vpack.c.bf16 %v137_v8, %v136_v7  ;;  %v139_v11 = vld [vmem:[#allocation4 + $0x38] sm:$0xff]  ;;  %v239_v31 = vld [vmem:[#allocation4 + $0x48] sm:$0xff]  ;;  %v240_v32 = vld [vmem:[#allocation4 + $0x50] sm:$0xff]  ;;  %s1876_s8 = smov 32  }
  0x29   :  { %1682 = vmatpush3.bf16.msra.mxu0 %v1681_v4  ;;  %v1687_v12 = vpack.c.bf16 %v139_v11, %v138_v10  ;;  %v1441_v13 = vld [vmem:[#allocation4 + $0x18] ss:$0 sm:$0xff]  ;;  %v1690_v33 = vpack.c.bf16 %v240_v32, %v239_v31  ;;  %v242_v35 = vld [vmem:[#allocation4 + $0x60] sm:$0xff]  ;;  %v336_v57 = vld [vmem:[#allocation4 + $0x70] sm:$0xff] }
  0x2a   :  { %1538 = vmatprep.subr.mxu0 %v1872_v1  ;;  %1685 = vmatpush3.bf16.msra.mxu1 %v1684_v9  ;;  %v241_v34 = vld [vmem:[#allocation4 + $0x58] sm:$0xff]  ;;  %v1443_v39 = vld [vmem:[#allocation4 + $0x40] ss:$0 sm:$0xff]  ;;  %v339_v61 = vld [vmem:[#allocation4 + $0x88] sm:$0xff] }
  0x2b   :  { %1686 = vmatprep.subr.bf16.mxu1 %v1870_v0  ;;  %v1693_v36 = vpack.c.bf16 %v242_v35, %v241_v34  ;;  %v337_v58 = vld [vmem:[#allocation4 + $0x78] sm:$0xff]  ;;  %v338_v60 = vld [vmem:[#allocation4 + $0x80] sm:$0xff]  ;;  %v1444_v63 = vld [vmem:[#allocation4 + $0x68] ss:$0 sm:$0xff] }
  0x2c   :  { %v1696_v59 = vpack.c.bf16 %v337_v58, %v336_v57  ;;  %v1699_v62 = vpack.c.bf16 %v339_v61, %v338_v60 }
  0x2d   :  { %1539 = vmatpush3.msra.mxu0 %v40_v5 }
  0x2e   :  { %1541 = vmatmul.mubr.msk.f32.vlgmr.msra.gmra.mrb[0].mxu0 %vm41_vm1, %v1930_v6  ;;  %1689 = vmatprep.subr.bf16.mxu0 %v1870_v0  ;;  %vm1428_vm1 = vcmask 15360  }
  0x2f   :  { %1562 = vmatprep.mubr.msk.f32.mxu0 %vm1871_vm0, %v1872_v1  ;;  %1688 = vmatpush3.bf16.msra.mxu1 %v1687_v12 }
  0x30   :  { %1695 = vmatprep.subr.bf16.mxu1 %v1870_v0  ;;  %1691 = vmatpush3.bf16.msra.mxu0 %v1690_v33 }
  0x31   :  { %1692 = vmatprep.subr.bf16.mxu0 %v1870_v0 }
  0x34   :  { %1694 = vmatpush3.bf16.msra.mxu0 %v1693_v36 }
  0x35   :  { %1701 = vmatprep.subr.bf16.mxu0 %v1870_v0 }
 0x101   :  { %v111_v14 = vpop.f32.mrb[0].mxu0 }
 0x102   :  { %v120_v15 = vadd.f32 %v1441_v13, %v111_v14  ;;  %141 = vrot.lane.b32.xlu0 %v111_v14, %s1873_s1  ;;  %v1542_v16 = vpop.f32.mrb[1].mxu0 }
 0x104   :  { %v122_v17 = vand.u32 2147483647, %v120_v15  ;;  %v121_v28 = vmax.f32 %v120_v15, 0.0 }
 0x106   :  { %v123_v18 = vsub.f32 0.0, %v122_v17  ;;  %712 = vrot.lane.b32.xlu0 %v1930_v6, %s1874_s6 }
 0x108   :  { %v124_v19 = vmul.f32 1.442695, %v123_v18 }
 0x10a   :  { %1766 = vpow2.f32 %v124_v19 }
 0x114   :  { %v1767_v20 = vpop.eup %1766 }
 0x115   :  { %v126_v21 = vadd.f32 1.0, %v1767_v20  ;;  %v129_v22 = vmul.f32 -0.5, %v1767_v20  ;;  %v132_v24 = vand.u32 2147483647, %v1767_v20 }
 0x117   :  { %1768 = vlog2.f32 %v126_v21  ;;  %v130_v23 = vadd.f32 1.0, %v129_v22  ;;  %vm133_vm2 = vcmp.lt.f32.partialorder %v132_v24, 0.0004427343  ;;  %v435_v21 = vld [vmem:[#allocation4 + $0xa0] sm:$0xff]  ;;  %v437_v24 = vld [vmem:[#allocation4 + $0xb0] sm:$0xff] }
 0x119   :  { %v131_v27 = vmul.f32 %v1767_v20, %v130_v23  ;;  %v434_v20 = vld [vmem:[#allocation4 + $0x98] sm:$0xff]  ;;  %v436_v23 = vld [vmem:[#allocation4 + $0xa8] sm:$0xff] }
 0x11a   :  { %v1702_v22 = vpack.c.bf16 %v435_v21, %v434_v20  ;;  %v1450_v21 = vld [vmem:[#allocation4 + $0xe0] ss:$0 sm:$0xff] }
 0x121   :  { %v1769_v25 = vpop.eup %1768 }
 0x122   :  { %v128_v26 = vmul.f32 0.6931472, %v1769_v25  ;;  %v1705_v25 = vpack.c.bf16 %v437_v24, %v436_v23 }
 0x124   :  { %v134_v29 = vsel %vm133_vm2, %v131_v27, %v128_v26  ;;  %v1446_v26 = vld [vmem:[#allocation4 + $0x90] ss:$0 sm:$0xff]  ;;  %vm1430_vm2 = vcmask 23552  }
 0x125   :  { %v135_v30 = vadd.f32 %v134_v29, %v121_v28 }
 0x127   :  { %1552 = vmatmul.mubr.msk.f32.vlgmr.msra.gmra.mrb[0].mxu1 %vm144_vm3, %v135_v30 }
 0x128   :  { %1573 = vmatprep.mubr.msk.f32.mxu1 %vm1871_vm0, %v1872_v1  ;;  %1697 = vmatpush3.bf16.msra.mxu1 %v1696_v59 }
 0x129   :  { %1698 = vmatprep.subr.bf16.mxu1 %v1870_v0 }
 0x12c   :  { %1700 = vmatpush3.bf16.msra.mxu1 %v1699_v62 }
 0x12d   :  { %1707 = vmatprep.subr.bf16.mxu1 %v1870_v0 }
 0x174   :  { %v142_v37 = vpop.permute.xlu0 %141 }
 0x1fa   :  { %v214_v38 = vpop.f32.mrb[0].mxu1 }
 0x1fb   :  { %v215_v40 = vadd.f32 %v214_v38, %v142_v37  ;;  %v1553_v41 = vpop.f32.mrb[1].mxu1 }
 0x1fd   :  { %v223_v42 = vadd.f32 %v1443_v39, %v215_v40 }
 0x1ff   :  { %v225_v43 = vand.u32 2147483647, %v223_v42  ;;  %v224_v54 = vmax.f32 %v223_v42, 0.0 }
 0x201   :  { %v226_v44 = vsub.f32 0.0, %v225_v43 }
 0x203   :  { %v227_v45 = vmul.f32 1.442695, %v226_v44  ;;  %v531_v44 = vld [vmem:[#allocation4 + $0xc0] sm:$0xff] }
 0x205   :  { %1770 = vpow2.f32 %v227_v45  ;;  %v532_v45 = vld [vmem:[#allocation4 + $0xc8] sm:$0xff] }
 0x20f   :  { %v1771_v46 = vpop.eup %1770 }
 0x210   :  { %v229_v47 = vadd.f32 1.0, %v1771_v46  ;;  %v232_v48 = vmul.f32 -0.5, %v1771_v46  ;;  %v235_v50 = vand.u32 2147483647, %v1771_v46 }
 0x212   :  { %1772 = vlog2.f32 %v229_v47  ;;  %v233_v49 = vadd.f32 1.0, %v232_v48  ;;  %vm236_vm4 = vcmp.lt.f32.partialorder %v235_v50, 0.0004427343  ;;  %v533_v47 = vld [vmem:[#allocation4 + $0xd0] sm:$0xff]  ;;  %v534_v48 = vld [vmem:[#allocation4 + $0xd8] sm:$0xff] }
 0x213   :  { %v1448_v50 = vld [vmem:[#allocation4 + $0xb8] ss:$0 sm:$0xff] }
 0x214   :  { %v234_v53 = vmul.f32 %v1771_v46, %v233_v49  ;;  %v1708_v46 = vpack.c.bf16 %v532_v45, %v531_v44  ;;  %v1711_v49 = vpack.c.bf16 %v534_v48, %v533_v47 }
 0x21c   :  { %v1773_v51 = vpop.eup %1772 }
 0x21d   :  { %v231_v52 = vmul.f32 0.6931472, %v1773_v51 }
 0x21f   :  { %v237_v55 = vsel %vm236_vm4, %v234_v53, %v231_v52  ;;  %vm1432_vm4 = vcmask 31744  }
 0x220   :  { %v238_v56 = vadd.f32 %v237_v55, %v224_v54 }
 0x222   :  { %1563 = vmatmul.mubr.msk.f32.vlgmr.msra.gmra.mrb[2].mxu0 %vm144_vm3, %v238_v56 }
 0x223   :  { %1584 = vmatprep.mubr.msk.f32.mxu0 %vm1871_vm0, %v1872_v1  ;;  %1703 = vmatpush3.bf16.msra.mxu0 %v1702_v22 }
 0x224   :  { %1704 = vmatprep.subr.bf16.mxu0 %v1870_v0 }
 0x227   :  { %1706 = vmatpush3.bf16.msra.mxu0 %v1705_v25  ;;  %v1455_v25 = vld [vmem:[#allocation4 + $0x118] ss:$0 sm:$0xff] }
 0x228   :  { %1713 = vmatprep.subr.bf16.mxu0 %v1870_v0 }
 0x2f5   :  { %v317_v2 = vpop.f32.mrb[2].mxu0 }
 0x2f6   :  { %v318_v3 = vadd.f32 %v1444_v63, %v317_v2  ;;  %v1564_v4 = vpop.f32.mrb[3].mxu0 }
 0x2f8   :  { %v322_v5 = vand.u32 2147483647, %v318_v3  ;;  %v321_v17 = vmax.f32 %v318_v3, 0.0 }
 0x2fa   :  { %v323_v7 = vsub.f32 0.0, %v322_v5 }
 0x2fc   :  { %v324_v8 = vmul.f32 1.442695, %v323_v7  ;;  %v711_v7 = vld [vmem:[#allocation4 + $0x110] sm:$0xff] }
 0x2fe   :  { %1774 = vpow2.f32 %v324_v8  ;;  %v713_v8 = vpop.permute.xlu0 %712 }
 0x308   :  { %v1775_v9 = vpop.eup %1774 }
 0x309   :  { %v326_v10 = vadd.f32 1.0, %v1775_v9  ;;  %v329_v11 = vmul.f32 -0.5, %v1775_v9  ;;  %v332_v13 = vand.u32 2147483647, %v1775_v9 }
 0x30b   :  { %1776 = vlog2.f32 %v326_v10  ;;  %v330_v12 = vadd.f32 1.0, %v329_v11  ;;  %vm333_vm5 = vcmp.lt.f32.partialorder %v332_v13, 0.0004427343  ;;  %v630_v10 = vld [vmem:[#allocation4 + $0xf0] sm:$0xff]  ;;  %v809_v13 = vld [vmem:[#allocation4 + $0x128] sm:$0xff] }
 0x30d   :  { %v331_v16 = vmul.f32 %v1775_v9, %v330_v12  ;;  %v629_v9 = vld [vmem:[#allocation4 + $0xe8] sm:$0xff]  ;;  %v808_v12 = vld [vmem:[#allocation4 + $0x120] sm:$0xff] }
 0x30e   :  { %v1714_v11 = vpack.c.bf16 %v630_v10, %v629_v9 }
 0x315   :  { %v1777_v14 = vpop.eup %1776 }
 0x316   :  { %v328_v15 = vmul.f32 0.6931472, %v1777_v14  ;;  %v1720_v14 = vpack.c.bf16 %v809_v13, %v808_v12 }
 0x318   :  { %v334_v18 = vsel %vm333_vm5, %v331_v16, %v328_v15  ;;  %v631_v15 = vld [vmem:[#allocation4 + $0xf8] sm:$0xff]  ;;  %v632_v16 = vld [vmem:[#allocation4 + $0x100] sm:$0xff] }
 0x319   :  { %v335_v19 = vadd.f32 %v334_v18, %v321_v17  ;;  %v1717_v17 = vpack.c.bf16 %v632_v16, %v631_v15  ;;  %v810_v18 = vld [vmem:[#allocation4 + $0x130] sm:$0xff] }
 0x31b   :  { %1574 = vmatmul.mubr.msk.f32.vlgmr.msra.gmra.mrb[2].mxu1 %vm144_vm3, %v335_v19  ;;  %v811_v19 = vld [vmem:[#allocation4 + $0x138] sm:$0xff] }
 0x31c   :  { %1595 = vmatprep.mubr.msk.f32.mxu1 %vm1871_vm0, %v1872_v1  ;;  %1709 = vmatpush3.bf16.msra.mxu1 %v1708_v46  ;;  %v1723_v20 = vpack.c.bf16 %v811_v19, %v810_v18 }
 0x31d   :  { %1710 = vmatprep.subr.bf16.mxu1 %v1870_v0 }
 0x320   :  { %1712 = vmatpush3.bf16.msra.mxu1 %v1711_v49 }
 0x321   :  { %1609 = vmatprep.subr.mxu1 %v1872_v1 }
 0x3ee   :  { %v414_v27 = vpop.f32.mrb[2].mxu1 }
 0x3ef   :  { %v415_v28 = vadd.f32 %v1446_v26, %v414_v27  ;;  %v1575_v29 = vpop.f32.mrb[3].mxu1 }
 0x3f1   :  { %v418_v30 = vadd.f32 %v415_v28, %v238_v56 }
 0x3f3   :  { %v420_v31 = vand.u32 2147483647, %v418_v30  ;;  %v419_v42 = vmax.f32 %v418_v30, 0.0 }
 0x3f5   :  { %v421_v32 = vsub.f32 0.0, %v420_v31 }
 0x3f7   :  { %v422_v33 = vmul.f32 1.442695, %v421_v32 }
 0x3f9   :  { %1778 = vpow2.f32 %v422_v33 }
 0x403   :  { %v1779_v34 = vpop.eup %1778 }
 0x404   :  { %v424_v35 = vadd.f32 1.0, %v1779_v34  ;;  %v427_v36 = vmul.f32 -0.5, %v1779_v34  ;;  %v430_v38 = vand.u32 2147483647, %v1779_v34 }
 0x406   :  { %1780 = vlog2.f32 %v424_v35  ;;  %v428_v37 = vadd.f32 1.0, %v427_v36  ;;  %vm431_vm6 = vcmp.lt.f32.partialorder %v430_v38, 0.0004427343 }
 0x408   :  { %v429_v41 = vmul.f32 %v1779_v34, %v428_v37 }
 0x410   :  { %v1781_v39 = vpop.eup %1780 }
 0x411   :  { %v426_v40 = vmul.f32 0.6931472, %v1781_v39 }
 0x413   :  { %v432_v6 = vsel %vm431_vm6, %v429_v41, %v426_v40 }
 0x414   :  { %v1955_v43 = vadd.f32 %v432_v6, %v419_v42 }
 0x416   :  { %1585 = vmatmul.mubr.msk.f32.vlgmr.msra.gmra.mrb[4].mxu0 %vm144_vm3, %v1955_v43 }
 0x417   :  { %1606 = vmatprep.mubr.msk.f32.mxu0 %vm1871_vm0, %v1872_v1  ;;  %1715 = vmatpush3.bf16.msra.mxu0 %v1714_v11 }
 0x418   :  { %1716 = vmatprep.subr.bf16.mxu0 %v1870_v0 }
 0x41b   :  { %1718 = vmatpush3.bf16.msra.mxu0 %v1717_v17 }
 0x41c   :  { %1725 = vmatprep.subr.bf16.mxu0 %v1870_v0 }
 0x4e9   :  { %v512_v51 = vpop.f32.mrb[4].mxu0 }
 0x4ea   :  { %v513_v52 = vadd.f32 %v1448_v50, %v512_v51  ;;  %v1586_v53 = vpop.f32.mrb[5].mxu0 }
 0x4ec   :  { %v517_v54 = vand.u32 2147483647, %v513_v52  ;;  %v516_v3 = vmax.f32 %v513_v52, 0.0 }
 0x4ee   :  { %v518_v55 = vsub.f32 0.0, %v517_v54 }
 0x4f0   :  { %v519_v56 = vmul.f32 1.442695, %v518_v55 }
 0x4f2   :  { %1782 = vpow2.f32 %v519_v56 }
 0x4fc   :  { %v1783_v57 = vpop.eup %1782 }
 0x4fd   :  { %v521_v58 = vadd.f32 1.0, %v1783_v57  ;;  %v524_v59 = vmul.f32 -0.5, %v1783_v57  ;;  %v527_v61 = vand.u32 2147483647, %v1783_v57 }
 0x4ff   :  { %1784 = vlog2.f32 %v521_v58  ;;  %v525_v60 = vadd.f32 1.0, %v524_v59  ;;  %vm528_vm7 = vcmp.lt.f32.partialorder %v527_v61, 0.0004427343  ;;  %v911_v58 = vld [vmem:[#allocation4 + $0x150] sm:$0xff]  ;;  %v913_v61 = vld [vmem:[#allocation4 + $0x160] sm:$0xff] }
 0x501   :  { %v526_v2 = vmul.f32 %v1783_v57, %v525_v60  ;;  %v910_v57 = vld [vmem:[#allocation4 + $0x148] sm:$0xff]  ;;  %v912_v60 = vld [vmem:[#allocation4 + $0x158] sm:$0xff] }
 0x502   :  { %v1726_v59 = vpack.c.bf16 %v911_v58, %v910_v57 }
 0x509   :  { %v1785_v62 = vpop.eup %1784 }
 0x50a   :  { %v523_v63 = vmul.f32 0.6931472, %v1785_v62  ;;  %v1729_v62 = vpack.c.bf16 %v913_v61, %v912_v60 }
 0x50c   :  { %v529_v4 = vsel %vm528_vm7, %v526_v2, %v523_v63 }
 0x50d   :  { %v530_v5 = vadd.f32 %v529_v4, %v516_v3 }
 0x50f   :  { %1596 = vmatmul.mubr.msk.f32.vlgmr.msra.gmra.mrb[4].mxu1 %vm144_vm3, %v530_v5  ;;  %v1457_v5 = vld [vmem:[#allocation4 + $0x140] ss:$0 sm:$0xff] }
 0x510   :  { %1610 = vmatpush3.msra.mxu1 %v711_v7  ;;  %1611 = vmatprep.mubr.msk.f32.mxu1 %vm1871_vm0, %v1872_v1 }
 0x511   :  { %1719 = vmatprep.subr.bf16.mxu1 %v1870_v0 }
 0x513   :  { %1612 = vmatmul.mubr.msk.f32.vlgmr.msra.gmra.mrb[6].mxu1 %vm714_vm8, %v713_v8 }
 0x514   :  { %1622 = vmatprep.mubr.msk.f32.mxu1 %vm1871_vm0, %v1872_v1  ;;  %1721 = vmatpush3.bf16.msra.mxu1 %v1720_v14 }
 0x515   :  { %1722 = vmatprep.subr.bf16.mxu1 %v1870_v0 }
 0x518   :  { %1724 = vmatpush3.bf16.msra.mxu1 %v1723_v20 }
 0x519   :  { %1731 = vmatprep.subr.bf16.mxu1 %v1870_v0 }
 0x5e2   :  { %v609_v22 = vpop.f32.mrb[4].mxu1 }
 0x5e3   :  { %v610_v23 = vadd.f32 %v1450_v21, %v609_v22  ;;  %v1597_v24 = vpop.f32.mrb[5].mxu1 }
 0x5e4   :  { %v1007_v24 = vld [vmem:[#allocation4 + $0x170] sm:$0xff] }
 0x5e5   :  { %v613_v26 = vadd.f32 %v610_v23, %v1955_v43 }
 0x5e6   :  { %v783_v27 = vpop.f32.mrb[6].mxu1 }
 0x5e7   :  { %v615_v28 = vand.u32 2147483647, %v613_v26  ;;  %v792_v29 = vadd.f32 %v1455_v25, %v783_v27  ;;  %813 = vrot.lane.b32.xlu1 %v783_v27, %s1873_s1  ;;  %v1613_v30 = vpop.f32.mrb[7].mxu1  ;;  %v614_v49 = vmax.f32 %v613_v26, 0.0  ;;  %v1008_v25 = vld [vmem:[#allocation4 + $0x178] sm:$0xff]  ;;  %v1009_v27 = vld [vmem:[#allocation4 + $0x180] sm:$0xff] }
 0x5e8   :  { %v1732_v26 = vpack.c.bf16 %v1008_v25, %v1007_v24  ;;  %v1458_v30 = vld [vmem:[#allocation4 + $0x168] ss:$0 sm:$0xff] }
 0x5e9   :  { %v616_v31 = vsub.f32 0.0, %v615_v28  ;;  %v794_v32 = vand.u32 2147483647, %v792_v29  ;;  %v793_v54 = vmax.f32 %v792_v29, 0.0  ;;  %v1010_v28 = vld [vmem:[#allocation4 + $0x188] sm:$0xff] }
 0x5ea   :  { %v1735_v29 = vpack.c.bf16 %v1010_v28, %v1009_v27 }
 0x5eb   :  { %v617_v33 = vmul.f32 1.442695, %v616_v31  ;;  %v795_v34 = vsub.f32 0.0, %v794_v32 }
 0x5ed   :  { %1786 = vpow2.f32 %v617_v33  ;;  %v796_v35 = vmul.f32 1.442695, %v795_v34 }
 0x5ef   :  { %1788 = vpow2.f32 %v796_v35 }
 0x5f7   :  { %v1787_v36 = vpop.eup %1786 }
 0x5f8   :  { %v619_v37 = vadd.f32 1.0, %v1787_v36  ;;  %v622_v40 = vmul.f32 -0.5, %v1787_v36  ;;  %v625_v6 = vand.u32 2147483647, %v1787_v36 }
 0x5f9   :  { %v1789_v38 = vpop.eup %1788 }
 0x5fa   :  { %1790 = vlog2.f32 %v619_v37  ;;  %v798_v39 = vadd.f32 1.0, %v1789_v38  ;;  %v801_v41 = vmul.f32 -0.5, %v1789_v38  ;;  %v623_v42 = vadd.f32 1.0, %v622_v40 }
 0x5fb   :  { %v804_v45 = vand.u32 2147483647, %v1789_v38  ;;  %vm626_vm9 = vcmp.lt.f32.partialorder %v625_v6, 0.0004427343 }
 0x5fc   :  { %1792 = vlog2.f32 %v798_v39  ;;  %v802_v43 = vadd.f32 1.0, %v801_v41  ;;  %v624_v47 = vmul.f32 %v1787_v36, %v623_v42 }
 0x5fd   :  { %vm805_vm10 = vcmp.lt.f32.partialorder %v804_v45, 0.0004427343 }
 0x5fe   :  { %v803_v52 = vmul.f32 %v1789_v38, %v802_v43 }
 0x604   :  { %v1791_v44 = vpop.eup %1790 }
 0x605   :  { %v621_v46 = vmul.f32 0.6931472, %v1791_v44 }
 0x606   :  { %v1793_v48 = vpop.eup %1792 }
 0x607   :  { %v627_v50 = vsel %vm626_vm9, %v624_v47, %v621_v46  ;;  %v800_v51 = vmul.f32 0.6931472, %v1793_v48  ;;  %v1105_v47 = vld [vmem:[#allocation4 + $0x198] sm:$0xff]  ;;  %v1106_v48 = vld [vmem:[#allocation4 + $0x1a0] sm:$0xff] }
 0x608   :  { %v628_v53 = vadd.f32 %v627_v50, %v614_v49  ;;  %v1738_v49 = vpack.c.bf16 %v1106_v48, %v1105_v47  ;;  %v1107_v50 = vld [vmem:[#allocation4 + $0x1a8] sm:$0xff] }
 0x609   :  { %v806_v55 = vsel %vm805_vm10, %v803_v52, %v800_v51  ;;  %v1108_v51 = vld [vmem:[#allocation4 + $0x1b0] sm:$0xff] }
 0x60a   :  { %v807_v56 = vadd.f32 %v806_v55, %v793_v54  ;;  %1607 = vmatmul.mubr.msk.f32.vlgmr.msra.gmra.mrb[6].mxu0 %vm144_vm3, %v628_v53  ;;  %v1741_v52 = vpack.c.bf16 %v1108_v51, %v1107_v50  ;;  %v1460_v53 = vld [vmem:[#allocation4 + $0x190] ss:$0 sm:$0xff] }
 0x60b   :  { %1633 = vmatprep.mubr.msk.f32.mxu0 %vm1871_vm0, %v1872_v1  ;;  %1727 = vmatpush3.bf16.msra.mxu0 %v1726_v59 }
 0x60c   :  { %1623 = vmatmul.mubr.msk.f32.vlgmr.msra.gmra.mrb[8].mxu1 %vm144_vm3, %v807_v56  ;;  %1728 = vmatprep.subr.bf16.mxu0 %v1870_v0 }
 0x60d   :  { %1644 = vmatprep.mubr.msk.f32.mxu1 %vm1871_vm0, %v1872_v1  ;;  %1733 = vmatpush3.bf16.msra.mxu1 %v1732_v26 }
 0x60e   :  { %1734 = vmatprep.subr.bf16.mxu1 %v1870_v0 }
 0x60f   :  { %1730 = vmatpush3.bf16.msra.mxu0 %v1729_v62 }
 0x610   :  { %1737 = vmatprep.subr.bf16.mxu0 %v1870_v0 }
 0x611   :  { %1736 = vmatpush3.bf16.msra.mxu1 %v1735_v29 }
 0x612   :  { %1743 = vmatprep.subr.bf16.mxu1 %v1870_v0 }
 0x659   :  { %v814_v3 = vpop.permute.xlu1 %813 }
 0x6dd   :  { %v1983_v63 = vpop.f32.mrb[6].mxu0 }
 0x6de   :  { %v1608_v2 = vpop.f32.mrb[7].mxu0 }
 0x6df   :  { %v885_v4 = vpop.f32.mrb[8].mxu1 }
 0x6e0   :  { %v886_v7 = vadd.f32 %v885_v4, %v814_v3  ;;  %v1624_v8 = vpop.f32.mrb[9].mxu1 }
 0x6e2   :  { %v894_v9 = vadd.f32 %v1457_v5, %v886_v7 }
 0x6e4   :  { %v896_v10 = vand.u32 2147483647, %v894_v9  ;;  %v895_v21 = vmax.f32 %v894_v9, 0.0 }
 0x6e6   :  { %v897_v11 = vsub.f32 0.0, %v896_v10 }
 0x6e8   :  { %v898_v12 = vmul.f32 1.442695, %v897_v11 }
 0x6ea   :  { %1794 = vpow2.f32 %v898_v12  ;;  %v1202_v12 = vld [vmem:[#allocation4 + $0x1c0] sm:$0xff] }
 0x6f4   :  { %v1795_v13 = vpop.eup %1794 }
 0x6f5   :  { %v900_v14 = vadd.f32 1.0, %v1795_v13  ;;  %v903_v15 = vmul.f32 -0.5, %v1795_v13  ;;  %v906_v17 = vand.u32 2147483647, %v1795_v13 }
 0x6f7   :  { %1796 = vlog2.f32 %v900_v14  ;;  %v904_v16 = vadd.f32 1.0, %v903_v15  ;;  %vm907_vm11 = vcmp.lt.f32.partialorder %v906_v17, 0.0004427343  ;;  %v1204_v15 = vld [vmem:[#allocation4 + $0x1d0] sm:$0xff] }
 0x6f9   :  { %v905_v20 = vmul.f32 %v1795_v13, %v904_v16  ;;  %v1203_v13 = vld [vmem:[#allocation4 + $0x1c8] sm:$0xff]  ;;  %v1205_v16 = vld [vmem:[#allocation4 + $0x1d8] sm:$0xff] }
 0x6fa   :  { %v1744_v14 = vpack.c.bf16 %v1203_v13, %v1202_v12  ;;  %v1747_v17 = vpack.c.bf16 %v1205_v16, %v1204_v15 }
 0x701   :  { %v1797_v18 = vpop.eup %1796 }
 0x702   :  { %v902_v19 = vmul.f32 0.6931472, %v1797_v18  ;;  %v1462_v18 = vld [vmem:[#allocation4 + $0x1b8] ss:$0 sm:$0xff] }
 0x704   :  { %v908_v22 = vsel %vm907_vm11, %v905_v20, %v902_v19 }
 0x705   :  { %v909_v23 = vadd.f32 %v908_v22, %v895_v21 }
 0x707   :  { %1634 = vmatmul.mubr.msk.f32.vlgmr.msra.gmra.mrb[8].mxu0 %vm144_vm3, %v909_v23 }
 0x708   :  { %1655 = vmatprep.mubr.msk.f32.mxu0 %vm1871_vm0, %v1872_v1  ;;  %1739 = vmatpush3.bf16.msra.mxu0 %v1738_v49 }
 0x709   :  { %1740 = vmatprep.subr.bf16.mxu0 %v1870_v0 }
 0x70c   :  { %1742 = vmatpush3.bf16.msra.mxu0 %v1741_v52 }
 0x70d   :  { %1749 = vmatprep.subr.bf16.mxu0 %v1870_v0 }
 0x7da   :  { %v988_v31 = vpop.f32.mrb[8].mxu0 }
 0x7db   :  { %v989_v32 = vadd.f32 %v1458_v30, %v988_v31  ;;  %v1635_v33 = vpop.f32.mrb[9].mxu0 }
 0x7dd   :  { %v993_v34 = vand.u32 2147483647, %v989_v32  ;;  %v992_v44 = vmax.f32 %v989_v32, 0.0 }
 0x7df   :  { %v994_v35 = vsub.f32 0.0, %v993_v34 }
 0x7e1   :  { %v995_v36 = vmul.f32 1.442695, %v994_v35  ;;  %v1300_v35 = vld [vmem:[#allocation4 + $0x1e8] sm:$0xff] }
 0x7e3   :  { %1798 = vpow2.f32 %v995_v36  ;;  %v1301_v36 = vld [vmem:[#allocation4 + $0x1f0] sm:$0xff] }
 0x7ed   :  { %v1799_v37 = vpop.eup %1798 }
 0x7ee   :  { %v997_v38 = vadd.f32 1.0, %v1799_v37  ;;  %v1000_v39 = vmul.f32 -0.5, %v1799_v37  ;;  %v1003_v41 = vand.u32 2147483647, %v1799_v37 }
 0x7f0   :  { %1800 = vlog2.f32 %v997_v38  ;;  %v1001_v40 = vadd.f32 1.0, %v1000_v39  ;;  %vm1004_vm12 = vcmp.lt.f32.partialorder %v1003_v41, 0.0004427343  ;;  %v1302_v38 = vld [vmem:[#allocation4 + $0x1f8] sm:$0xff]  ;;  %v1303_v39 = vld [vmem:[#allocation4 + $0x200] sm:$0xff] }
 0x7f1   :  { %v1464_v41 = vld [vmem:[#allocation4 + $0x1e0] ss:$0 sm:$0xff] }
 0x7f2   :  { %v1002_v43 = vmul.f32 %v1799_v37, %v1001_v40  ;;  %v1750_v37 = vpack.c.bf16 %v1301_v36, %v1300_v35  ;;  %v1753_v40 = vpack.c.bf16 %v1303_v39, %v1302_v38 }
 0x7fa   :  { %v1801_v42 = vpop.eup %1800 }
 0x7fb   :  { %v999_v6 = vmul.f32 0.6931472, %v1801_v42 }
 0x7fd   :  { %v1005_v45 = vsel %vm1004_vm12, %v1002_v43, %v999_v6 }
 0x7fe   :  { %v1006_v46 = vadd.f32 %v1005_v45, %v992_v44 }
 0x800   :  { %1645 = vmatmul.mubr.msk.f32.vlgmr.msra.gmra.mrb[10].mxu1 %vm144_vm3, %v1006_v46 }
 0x801   :  { %1666 = vmatprep.mubr.msk.f32.mxu1 %vm1871_vm0, %v1872_v1  ;;  %1745 = vmatpush3.bf16.msra.mxu1 %v1744_v14 }
 0x802   :  { %1746 = vmatprep.subr.bf16.mxu1 %v1870_v0 }
 0x805   :  { %1748 = vmatpush3.bf16.msra.mxu1 %v1747_v17 }
 0x8d3   :  { %v1085_v54 = vpop.f32.mrb[10].mxu1 }
 0x8d4   :  { %v1086_v55 = vadd.f32 %v1460_v53, %v1085_v54  ;;  %v1646_v56 = vpop.f32.mrb[11].mxu1 }
 0x8d6   :  { %v1089_v57 = vadd.f32 %v1086_v55, %v909_v23 }
 0x8d8   :  { %v1091_v58 = vand.u32 2147483647, %v1089_v57  ;;  %v1090_v9 = vmax.f32 %v1089_v57, 0.0 }
 0x8da   :  { %v1092_v59 = vsub.f32 0.0, %v1091_v58  ;;  %v1466_v58 = vld [vmem:[#allocation4 + $0x208] ss:$0 sm:$0xff] }
 0x8dc   :  { %v1093_v60 = vmul.f32 1.442695, %v1092_v59 }
 0x8de   :  { %1802 = vpow2.f32 %v1093_v60 }
 0x8e8   :  { %v1803_v61 = vpop.eup %1802 }
 0x8e9   :  { %v1095_v62 = vadd.f32 1.0, %v1803_v61  ;;  %v1098_v2 = vmul.f32 -0.5, %v1803_v61  ;;  %v1101_v4 = vand.u32 2147483647, %v1803_v61 }
 0x8eb   :  { %1804 = vlog2.f32 %v1095_v62  ;;  %v1099_v3 = vadd.f32 1.0, %v1098_v2  ;;  %vm1102_vm13 = vcmp.lt.f32.partialorder %v1101_v4, 0.0004427343 }
 0x8ed   :  { %v1100_v8 = vmul.f32 %v1803_v61, %v1099_v3 }
 0x8f5   :  { %v1805_v5 = vpop.eup %1804 }
 0x8f6   :  { %v1097_v7 = vmul.f32 0.6931472, %v1805_v5  ;;  %v1452_v5 = vld [vmem:[#allocation4 + $0x108] ss:$0 sm:$0xff] }
 0x8f8   :  { %v1103_v10 = vsel %vm1102_vm13, %v1100_v8, %v1097_v7  ;;  %v708_v7 = vadd.f32 %v1452_v5, %v1983_v63 }
 0x8f9   :  { %v1104_v11 = vadd.f32 %v1103_v10, %v1090_v9 }
 0x8fb   :  { %1656 = vmatmul.mubr.msk.f32.vlgmr.msra.gmra.mrb[10].mxu0 %vm144_vm3, %v1104_v11 }
 0x8fc   :  { %1677 = vmatprep.mubr.msk.f32.mxu0 %vm1871_vm0, %v1872_v1  ;;  %1751 = vmatpush3.bf16.msra.mxu0 %v1750_v37  ;;  %vm1426_vm0 = vcmask 7168  }
 0x8fd   :  { %1752 = vmatprep.subr.bf16.mxu0 %v1870_v0 }
 0x900   :  { %1754 = vmatpush3.bf16.msra.mxu0 %v1753_v40 }
 0x9ce   :  { %v1183_v19 = vpop.f32.mrb[10].mxu0 }
 0x9cf   :  { %v1184_v20 = vadd.f32 %v1462_v18, %v1183_v19  ;;  %v1657_v21 = vpop.f32.mrb[11].mxu0 }
 0x9d1   :  { %v1188_v22 = vand.u32 2147483647, %v1184_v20  ;;  %v1187_v32 = vmax.f32 %v1184_v20, 0.0 }
 0x9d3   :  { %v1189_v23 = vsub.f32 0.0, %v1188_v22 }
 0x9d5   :  { %v1190_v24 = vmul.f32 1.442695, %v1189_v23 }
 0x9d7   :  { %1806 = vpow2.f32 %v1190_v24 }
 0x9e1   :  { %v1807_v25 = vpop.eup %1806 }
 0x9e2   :  { %v1192_v1 = vadd.f32 1.0, %v1807_v25  ;;  %v1195_v26 = vmul.f32 -0.5, %v1807_v25  ;;  %v1198_v28 = vand.u32 2147483647, %v1807_v25 }
 0x9e4   :  { %1808 = vlog2.f32 %v1192_v1  ;;  %v1196_v27 = vadd.f32 1.0, %v1195_v26  ;;  %vm1199_vm14 = vcmp.lt.f32.partialorder %v1198_v28, 0.0004427343 }
 0x9e6   :  { %v1197_v31 = vmul.f32 %v1807_v25, %v1196_v27 }
 0x9ee   :  { %v1809_v29 = vpop.eup %1808 }
 0x9ef   :  { %v1194_v30 = vmul.f32 0.6931472, %v1809_v29 }
 0x9f1   :  { %v1200_v33 = vsel %vm1199_vm14, %v1197_v31, %v1194_v30 }
 0x9f2   :  { %v1201_v34 = vadd.f32 %v1200_v33, %v1187_v32 }
 0x9f4   :  { %1667 = vmatmul.mubr.msk.f32.vlgmr.msra.gmra.mrb[12].mxu1 %vm144_vm3, %v1201_v34 }
 0xac7   :  { %v1280_v42 = vpop.f32.mrb[12].mxu1 }
 0xac8   :  { %v1281_v6 = vadd.f32 %v1464_v41, %v1280_v42  ;;  %v1668_v43 = vpop.f32.mrb[13].mxu1 }
 0xaca   :  { %v1284_v44 = vadd.f32 %v1281_v6, %v1104_v11 }
 0xacc   :  { %v1286_v45 = vand.u32 2147483647, %v1284_v44  ;;  %v1285_v55 = vmax.f32 %v1284_v44, 0.0 }
 0xace   :  { %v1287_v46 = vsub.f32 0.0, %v1286_v45 }
 0xad0   :  { %v1288_v47 = vmul.f32 1.442695, %v1287_v46 }
 0xad2   :  { %1810 = vpow2.f32 %v1288_v47 }
 0xadc   :  { %v1811_v48 = vpop.eup %1810 }
 0xadd   :  { %v1290_v49 = vadd.f32 1.0, %v1811_v48  ;;  %v1293_v50 = vmul.f32 -0.5, %v1811_v48  ;;  %v1296_v52 = vand.u32 2147483647, %v1811_v48 }
 0xadf   :  { %1812 = vlog2.f32 %v1290_v49  ;;  %v1294_v51 = vadd.f32 1.0, %v1293_v50  ;;  %vm1297_vm15 = vcmp.lt.f32.partialorder %v1296_v52, 0.0004427343 }
 0xae1   :  { %v1295_v54 = vmul.f32 %v1811_v48, %v1294_v51 }
 0xae9   :  { %v1813_v0 = vpop.eup %1812 }
 0xaea   :  { %v1292_v53 = vmul.f32 0.6931472, %v1813_v0 }
 0xaec   :  { %v1298_v56 = vsel %vm1297_vm15, %v1295_v54, %v1292_v53 }
 0xaed   :  { %v1299_v57 = vadd.f32 %v1298_v56, %v1285_v55 }
 0xaef   :  { %1678 = vmatmul.mubr.msk.f32.vlgmr.msra.gmra.mrb[12].mxu0 %vm144_vm3, %v1299_v57 }
 0xbc2   :  { %v1378_v59 = vpop.f32.mrb[12].mxu0 }
 0xbc3   :  { %v1379_v60 = vadd.f32 %v1466_v58, %v1378_v59  ;;  %v1679_v61 = vpop.f32.mrb[13].mxu0 }
 0xbc5   :  { %v1382_v62 = vsub.f32 0.0, %v1379_v60 }
 0xbc7   :  { %v1383_v2 = vmul.f32 1.442695, %v1382_v62 }
 0xbc9   :  { %1814 = vpow2.f32 %v1383_v2 }
 0xbd3   :  { %v1815_v3 = vpop.eup %1814 }
 0xbd4   :  { %v1385_v4 = vadd.f32 1.0, %v1815_v3 }
 0xbd6   :  { %1816 = vrcp.f32 %v1385_v4 }
 0xbe0   :  { %v1817_v8 = vpop.eup %1816 }
 0xbe1   :  { %1404 = vrot.lane.b32.xlu0 %v1817_v8, %s1875_s7  ;;  %1393 = vrot.lane.b32.xlu1 %v1817_v8, %s1876_s8  ;;  %v1388_v9 = vmul.f32 %v1817_v8, %v708_v7 }
 0xbe3   :  { %v1389_v63 = vsel %vm144_vm3, %v1388_v9, 0.0 }
 0xbe5   :  { %1415 = vrot.lane.b32.xlu1 %v1817_v8, %s1873_s1 }
 0xc53   :  { %v1405_v10 = vpop.permute.xlu0 %1404  ;;  %v1394_v11 = vpop.permute.xlu1 %1393 }
 0xc54   :  { %v1407_v12 = vmul.f32 %v1405_v10, %v708_v7  ;;  %v1396_v13 = vmul.f32 %v1394_v11, %v708_v7 }
 0xc56   :  { %1409 = vrot.lane.b32.xlu1 %v1407_v12, %s1875_s7  ;;  %1398 = vrot.lane.b32.xlu0 %v1396_v13, %s1873_s1 }
 0xc57   :  { %v1416_v14 = vpop.permute.xlu1 %1415 }
 0xc58   :  { %v1418_v15 = vmul.f32 %v1416_v14, %v708_v7 }
 0xc5a   :  { %1420 = vrot.lane.b32.xlu0 %v1418_v15, %s1876_s8 }
 0xc7a   :  { %1390 = vadd.xlane.f32.xlu1 %v1389_v63 }
 0xcc8   :  { %v1399_v16 = vpop.permute.xlu0 %1398  ;;  %v1410_v18 = vpop.permute.xlu1 %1409 }
 0xcc9   :  { %v1401_v17 = vsel %vm144_vm3, %v1399_v16, 0.0  ;;  %v1412_v20 = vsel %vm144_vm3, %v1410_v18, 0.0 }
 0xcca   :  { %1402 = vadd.xlane.f32.xlu0 %v1401_v17 }
 0xccc   :  { %v1421_v19 = vpop.permute.xlu0 %1420 }
 0xccd   :  { %v1423_v21 = vsel %vm144_vm3, %v1421_v19, 0.0 }
 0xcce   :  { %1413 = vadd.xlane.f32.xlu0 %v1412_v20  ;;  %1424 = vadd.xlane.f32.xlu1 %v1423_v21 }
 0xd07   :  { %v1391_v22 = vpop.xlane.xlu1 %1390 }
 0xd57   :  { %v1403_v23 = vpop.xlane.xlu0 %1402 }
 0xd58   :  { %v1427_v24 = vsel %vm1426_vm0, %v1391_v22, %v1403_v23 }
 0xd5b   :  { %v1414_v25 = vpop.xlane.xlu0 %1413  ;;  %v1425_v1 = vpop.xlane.xlu1 %1424 }
 0xd5c   :  { %v1429_v26 = vsel %vm1428_vm1, %v1427_v24, %v1414_v25 }
 0xd5d   :  { %v1431_v27 = vsel %vm1430_vm2, %v1429_v26, %v1425_v1 }
 0xd5e   :  { %1433 = vst.msk [vmem:[%s2014_s2] sm:$0xff] %vm1432_vm4, %v1431_v27 }
 0xd5f   :  { %1438 = vsyncpa [#allocation3], 1 }
 0xd60   :  { %1439 = vsyncpa [#allocation5], 1 }

</bundles_post_ra>
